<compile_context>
chip_gen: v5e
topology: v5e:2x2
jax: 0.10.0
libtpu: 0.0.40
codegen_flags: <defaults>
</compile_context>

<pallas_src>
import jax
import jax.numpy as jnp
from jax.experimental import pallas as pl
from jax.experimental.pallas import tpu as pltpu

IN_FEATURES = 28 * 28          # 784  (multiple of 8 -> legal sublane dim)
OUT_FEATURES = 10
N_PAD = 128                    # lane-dense output width
DEFAULT_BLOCK_BATCH = 1024     # ~8 MiB VMEM footprint; safe on v5e/v6e/v7x


def _round_up(x, m):
    return ((x + m - 1) // m) * m


def _linear_kernel(x_ref, w_ref, b_ref, o_ref):
    # x_ref: (TB, 784)  w_ref: (784, 128)  b_ref: (1, 128)  o_ref: (TB, 128)
    acc = jnp.dot(x_ref[...], w_ref[...], preferred_element_type=jnp.float32)
    o_ref[...] = (acc + b_ref[...]).astype(o_ref.dtype)


def logistic_regression_forward(x, weight, bias, *, block_batch=DEFAULT_BLOCK_BATCH):
    """Forward pass of LogisticRegression.

    x:      (B, 1, 28, 28) or anything reshapeable to (-1, 784), float32
    weight: (10, 784) float32  (PyTorch nn.Linear convention)
    bias:   (10,)     float32
    returns (B, 10) float32 logits
    """
    x2d = x.reshape(-1, IN_FEATURES).astype(jnp.float32)
    batch = x2d.shape[0]

    # --- Pad only the tiny parameters: N 10 -> 128 (zeros preserve exactness). ---
    w_p = jnp.pad(weight.T.astype(jnp.float32),
                  ((0, 0), (0, N_PAD - OUT_FEATURES)))          # (784, 128)
    b_p = jnp.pad(bias.astype(jnp.float32).reshape(1, OUT_FEATURES),
                  ((0, 0), (0, N_PAD - OUT_FEATURES)))          # (1, 128)

    # --- Batch tiling: TB multiple of 8; partial last block handled by Pallas. ---
    tb = min(block_batch, _round_up(max(batch, 1), 8))
    tb = _round_up(tb, 8)
    grid = (pl.cdiv(batch, tb),)

    # VMEM budget: double-buffered x + out tiles, resident weight/bias, margin.
    # (lane dim 784 pads to 896 inside VMEM.)
    k_vmem = _round_up(IN_FEATURES, 128)
    footprint = (2 * tb * k_vmem * 4 +         # x double buffers
                 2 * tb * N_PAD * 4 +          # out double buffers
                 k_vmem * N_PAD * 4 +          # weight (resident)
                 N_PAD * 4)                    # bias
    vmem_limit = min(max(2 * footprint, 32 * 1024 * 1024), 64 * 1024 * 1024)

    cost = pl.CostEstimate(
        flops=2 * batch * IN_FEATURES * N_PAD,
        transcendentals=0,
        bytes_accessed=(batch * IN_FEATURES * 4
                        + IN_FEATURES * N_PAD * 4
                        + N_PAD * 4
                        + batch * N_PAD * 4),
    )

    out_wide = pl.pallas_call(
        _linear_kernel,
        out_shape=jax.ShapeDtypeStruct((batch, N_PAD), jnp.float32),
        grid_spec=pltpu.PrefetchScalarGridSpec(
            num_scalar_prefetch=0,
            grid=grid,
            in_specs=[
                pl.BlockSpec((tb, IN_FEATURES), lambda i: (i, 0)),   # x streams
                pl.BlockSpec((IN_FEATURES, N_PAD), lambda i: (0, 0)),  # W resident
                pl.BlockSpec((1, N_PAD), lambda i: (0, 0)),            # b resident
            ],
            out_specs=pl.BlockSpec((tb, N_PAD), lambda i: (i, 0)),
        ),
        compiler_params=pltpu.CompilerParams(
            dimension_semantics=("parallel",),
            vmem_limit_bytes=vmem_limit,
        ),
        cost_estimate=cost,
    )(x2d, w_p, b_p)

    return out_wide[:, :OUT_FEATURES]


if __name__ == "__main__":
    key = jax.random.PRNGKey(0)
    kx, kw, kb = jax.random.split(key, 3)

    # Deterministic synthetic parameters (nn.Linear(784, 10) shapes).
    bound = 1.0 / (IN_FEATURES ** 0.5)
    weight = jax.random.uniform(
        kw, (OUT_FEATURES, IN_FEATURES), jnp.float32, -bound, bound)
    bias = jax.random.uniform(
        kb, (OUT_FEATURES,), jnp.float32, -bound, bound)

    # Small MNIST-like batch, NCHW.
    x = jax.random.normal(kx, (2, 1, 28, 28), jnp.float32)

    y = logistic_regression_forward(x, weight, bias)
    y = jax.block_until_ready(y)

    # Pure-JAX reference check.
    y_ref = x.reshape(-1, IN_FEATURES) @ weight.T + bias
    assert y.shape == (2, OUT_FEATURES)
    assert jnp.allclose(y, y_ref, atol=1e-4, rtol=1e-4)

    print("KERNEL_OK")
</pallas_src>

<mosaic_0001>
module attributes {stable_mosaic.version = 11 : i64} {
  func.func @_linear_kernel(%arg0: i32, %arg1: memref<8x784xf32, #tpu.memory_space<vmem>>, %arg2: memref<784x128xf32, #tpu.memory_space<vmem>>, %arg3: memref<1x128xf32, #tpu.memory_space<vmem>>, %arg4: memref<8x128xf32, #tpu.memory_space<vmem>>) attributes {dimension_semantics = [#tpu.dimension_semantics<parallel>], iteration_bounds = array<i64: 1>, scalar_prefetch = 0 : i64, scratch_operands = 0 : i64, tpu.core_type = #tpu.core_type<tc>, window_params = [{transform_indices = @transform_0, window_bounds = array<i64: 8, 784>}, {pipeline_mode = #tpu.pipeline_mode<synchronous>, transform_indices = @transform_1, window_bounds = array<i64: 784, 128>}, {pipeline_mode = #tpu.pipeline_mode<synchronous>, transform_indices = @transform_2, window_bounds = array<i64: 1, 128>}, {transform_indices = @transform_3, window_bounds = array<i64: 8, 128>}]} {
    %c0 = arith.constant 0 : index
    %c0_0 = arith.constant 0 : index
    %0 = vector.load %arg1[%c0, %c0_0] : memref<8x784xf32, #tpu.memory_space<vmem>>, vector<8x784xf32>
    %c0_1 = arith.constant 0 : index
    %c0_2 = arith.constant 0 : index
    %1 = vector.load %arg2[%c0_1, %c0_2] : memref<784x128xf32, #tpu.memory_space<vmem>>, vector<784x128xf32>
    %cst = arith.constant dense<0.000000e+00> : vector<8x128xf32>
    %2 = tpu.matmul %0, %1, %cst {dimension_numbers = #tpu.dot_dimension_numbers<[1], [0], [0], [1], [0, 0, 1, 1], [], []>} : vector<8x784xf32>, vector<784x128xf32>, vector<8x128xf32> -> vector<8x128xf32>
    %c0_3 = arith.constant 0 : index
    %c0_4 = arith.constant 0 : index
    %3 = vector.load %arg3[%c0_3, %c0_4] : memref<1x128xf32, #tpu.memory_space<vmem>>, vector<1x128xf32>
    %4 = vector.broadcast %3 : vector<1x128xf32> to vector<8x128xf32>
    %5 = arith.addf %2, %4 : vector<8x128xf32>
    %c0_5 = arith.constant 0 : index
    %c0_6 = arith.constant 0 : index
    %6 = vector.load %arg4[%c0_5, %c0_6] : memref<8x128xf32, #tpu.memory_space<vmem>>, vector<8x128xf32>
    tpu.vector_store %arg4[%c0_5, %c0_6], %5 {strides = array<i32>} : memref<8x128xf32, #tpu.memory_space<vmem>>, vector<8x128xf32>,
    return
  }
  func.func @transform_0(%arg0: i32) -> (i32, i32) {
    %c0_i32 = arith.constant 0 : i32
    %c0_i32_0 = arith.constant 0 : i32
    return %arg0, %c0_i32 : i32, i32
  }
  func.func @transform_1(%arg0: i32) -> (i32, i32) {
    %c0_i32 = arith.constant 0 : i32
    %c0_i32_0 = arith.constant 0 : i32
    %c0_i32_1 = arith.constant 0 : i32
    return %c0_i32, %c0_i32_0 : i32, i32
  }
  func.func @transform_2(%arg0: i32) -> (i32, i32) {
    %c0_i32 = arith.constant 0 : i32
    %c0_i32_0 = arith.constant 0 : i32
    %c0_i32_1 = arith.constant 0 : i32
    return %c0_i32, %c0_i32_0 : i32, i32
  }
  func.func @transform_3(%arg0: i32) -> (i32, i32) {
    %c0_i32 = arith.constant 0 : i32
    %c0_i32_0 = arith.constant 0 : i32
    return %arg0, %c0_i32 : i32, i32
  }
}

</mosaic_0001>

<bundles_post_ra>
// kernel: tpu_custom_call.1
= control target key start
LH: loop header
LB: loop body
LE: loop exit
PB: predicated region body
PF: predicated region fallthrough
CT: control target
= control target key end

     0   :  { %8 = vsyncpa [#allocation3], 0  ;;  %s487_s0 = inlined_call_operand.hbm [shape: f32[2,784], index: 0, kind: input, shape index: {}]   ;;  %s488_s1 = inlined_call_operand.hbm [shape: f32[784,128], index: 1, kind: input, shape index: {}]   ;;  %s489_s2 = inlined_call_operand.vmem [shape: f32[1,128], index: 2, kind: input, shape index: {}]   ;;  %s490_s3 = inlined_call_operand.hbm [shape: f32[2,128], index: 3, kind: output, shape index: {}]  }
   0x1   :  { %9 = vsyncpa [#allocation6], 0 }
   0x2   :  { %10 = vsyncpa [#allocation4], 0 }
   0x3   :  { %14 = vsyncadd [#allocation3], 672  ;;  %s15_s14 = sshll.u32 %s487_s0, 4  ;;  %s446_s15 = smov [#allocation2]   ;;  %s16_s14 = int_to_ptr.hbm [resolvable:$true] %s15_s14 }
   0x4   :  { %s17_s16 = sshll.u32 %s446_s15, 4  ;;  %s28_s19 = sshll.u32 %s488_s1, 4  ;;  %s18_s16 = int_to_ptr.vmem [resolvable:$true] %s17_s16  ;;  %s29_s19 = int_to_ptr.hbm [resolvable:$true] %s28_s19 }
   0x5   :  { %s447_s20 = smov 224   ;;  %s448_s21 = smov 14  }
   0x6   :  { %23 = dma.hbm_to_vmem [thread:$0]  %s16_s14, 224, %s18_s16, [#allocation3], %s447_s20, %s447_s20, %s448_s21  }
   0x7   :  { %s449_s22 = smov [#allocation5]   ;;  %s450_s24 = smov 128  }
   0x8   :  { %s30_s23 = sshll.u32 %s449_s22, 4  ;;  %s451_s25 = smov 8   ;;  %s31_s23 = int_to_ptr.vmem [resolvable:$true] %s30_s23 }
   0x9   :  { %36 = dma.hbm_to_vmem [thread:$0]  %s29_s19, 12544, %s31_s23, [#allocation6], %s450_s24, %s450_s24, %s451_s25  }
   0xa   :  { %440 = dma.done.wait [#allocation3], 896  }
   0xb   :  { %441 = vsyncadd [#allocation3], 4294966400 }
   0xc   :  { %442 = dma.done.wait [#allocation6], 12544  }
   0xd   :  { %443 = vsyncadd [#allocation6], 4294954752  ;;  %v70_v0 = vld [vmem:[#allocation5 + $0x78] sm:$0xff]  ;;  %v69_v1 = vld [vmem:[#allocation5 + $0x70] sm:$0xff]  ;;  %vm193_vm0 = vcmask 130048  }
   0xe   :  { %v86_v2 = vld [vmem:[#allocation5 + $0xf8] sm:$0xff]  ;;  %196 = vmatpush.msra.mxu0 %v70_v0  ;;  %v85_v3 = vld [vmem:[#allocation5 + $0xf0] sm:$0xff]  ;;  %v68_v4 = vld [vmem:[#allocation5 + $0x68] sm:$0xff] }
   0xf   :  { %216 = vmatpush.msra.mxu1 %v86_v2  ;;  %v84_v5 = vld [vmem:[#allocation5 + $0xe8] sm:$0xff]  ;;  %v67_v6 = vld [vmem:[#allocation5 + $0x60] sm:$0xff]  ;;  %v66_v8 = vld [vmem:[#allocation5 + $0x58] sm:$0xff] }
  0x10   :  { %197 = vmatpush.msra.mxu0 %v69_v1  ;;  %v83_v7 = vld [vmem:[#allocation5 + $0xe0] sm:$0xff]  ;;  %v82_v9 = vld [vmem:[#allocation5 + $0xd8] sm:$0xff]  ;;  %v65_v10 = vld [vmem:[#allocation5 + $0x50] sm:$0xff] }
  0x11   :  { %217 = vmatpush.msra.mxu1 %v85_v3  ;;  %v102_v11 = vld [vmem:[#allocation5 + $0x178] sm:$0xff]  ;;  %v81_v12 = vld [vmem:[#allocation5 + $0xd0] sm:$0xff]  ;;  %v100_v15 = vld [vmem:[#allocation5 + $0x168] sm:$0xff] }
  0x12   :  { %198 = vmatpush.msra.mxu0 %v68_v4  ;;  %236 = vmatpush.msra.mxu2 %v102_v11  ;;  %v101_v13 = vld [vmem:[#allocation5 + $0x170] sm:$0xff]  ;;  %v118_v14 = vld [vmem:[#allocation5 + $0x1f8] sm:$0xff]  ;;  %v64_v17 = vld [vmem:[#allocation5 + $0x48] sm:$0xff] }
  0x13   :  { %218 = vmatpush.msra.mxu1 %v84_v5  ;;  %v117_v16 = vld [vmem:[#allocation5 + $0x1f0] sm:$0xff]  ;;  %v80_v18 = vld [vmem:[#allocation5 + $0xc8] sm:$0xff]  ;;  %256 = vmatpush.msra.mxu3 %v118_v14  ;;  %v99_v19 = vld [vmem:[#allocation5 + $0x160] sm:$0xff] }
  0x14   :  { %199 = vmatpush.msra.mxu0 %v67_v6  ;;  %237 = vmatpush.msra.mxu2 %v101_v13  ;;  %v116_v20 = vld [vmem:[#allocation5 + $0x1e8] sm:$0xff]  ;;  %v63_v21 = vld [vmem:[#allocation5 + $0x40] sm:$0xff]  ;;  %v98_v23 = vld [vmem:[#allocation5 + $0x158] sm:$0xff] }
  0x15   :  { %219 = vmatpush.msra.mxu1 %v83_v7  ;;  %v79_v22 = vld [vmem:[#allocation5 + $0xc0] sm:$0xff]  ;;  %257 = vmatpush.msra.mxu3 %v117_v16  ;;  %v62_v25 = vld [vmem:[#allocation5 + $0x38] sm:$0xff]  ;;  %v97_v27 = vld [vmem:[#allocation5 + $0x150] sm:$0xff] }
  0x16   :  { %200 = vmatpush.msra.mxu0 %v66_v8  ;;  %238 = vmatpush.msra.mxu2 %v100_v15  ;;  %v115_v24 = vld [vmem:[#allocation5 + $0x1e0] sm:$0xff]  ;;  %v78_v26 = vld [vmem:[#allocation5 + $0xb8] sm:$0xff]  ;;  %v61_v29 = vld [vmem:[#allocation5 + $0x30] sm:$0xff] }
  0x17   :  { %220 = vmatpush.msra.mxu1 %v82_v9  ;;  %258 = vmatpush.msra.mxu3 %v116_v20  ;;  %v114_v28 = vld [vmem:[#allocation5 + $0x1d8] sm:$0xff]  ;;  %v77_v30 = vld [vmem:[#allocation5 + $0xb0] sm:$0xff]  ;;  %v96_v31 = vld [vmem:[#allocation5 + $0x148] sm:$0xff] }
  0x18   :  { %201 = vmatpush.msra.mxu0 %v65_v10  ;;  %239 = vmatpush.msra.mxu2 %v99_v19  ;;  %v113_v32 = vld [vmem:[#allocation5 + $0x1d0] sm:$0xff]  ;;  %v60_v33 = vld [vmem:[#allocation5 + $0x28] sm:$0xff]  ;;  %v95_v35 = vld [vmem:[#allocation5 + $0x140] sm:$0xff] }
  0x19   :  { %221 = vmatpush.msra.mxu1 %v81_v12  ;;  %259 = vmatpush.msra.mxu3 %v115_v24  ;;  %v76_v34 = vld [vmem:[#allocation5 + $0xa8] sm:$0xff]  ;;  %v59_v37 = vld [vmem:[#allocation5 + $0x20] sm:$0xff]  ;;  %v94_v39 = vld [vmem:[#allocation5 + $0x138] sm:$0xff] }
  0x1a   :  { %202 = vmatpush.msra.mxu0 %v64_v17  ;;  %240 = vmatpush.msra.mxu2 %v98_v23  ;;  %v112_v36 = vld [vmem:[#allocation5 + $0x1c8] sm:$0xff]  ;;  %v75_v38 = vld [vmem:[#allocation5 + $0xa0] sm:$0xff]  ;;  %v58_v41 = vld [vmem:[#allocation5 + $0x18] sm:$0xff] }
  0x1b   :  { %222 = vmatpush.msra.mxu1 %v80_v18  ;;  %260 = vmatpush.msra.mxu3 %v114_v28  ;;  %v111_v40 = vld [vmem:[#allocation5 + $0x1c0] sm:$0xff]  ;;  %v74_v42 = vld [vmem:[#allocation5 + $0x98] sm:$0xff]  ;;  %v93_v43 = vld [vmem:[#allocation5 + $0x130] sm:$0xff] }
  0x1c   :  { %203 = vmatpush.msra.mxu0 %v63_v21  ;;  %241 = vmatpush.msra.mxu2 %v97_v27  ;;  %v110_v44 = vld [vmem:[#allocation5 + $0x1b8] sm:$0xff]  ;;  %v57_v45 = vld [vmem:[#allocation5 + $0x10] sm:$0xff]  ;;  %v92_v47 = vld [vmem:[#allocation5 + $0x128] sm:$0xff] }
  0x1d   :  { %223 = vmatpush.msra.mxu1 %v79_v22  ;;  %261 = vmatpush.msra.mxu3 %v113_v32  ;;  %v73_v46 = vld [vmem:[#allocation5 + $0x90] sm:$0xff]  ;;  %v56_v49 = vld [vmem:[#allocation5 + $0x8] sm:$0xff]  ;;  %v55_v50 = vld [vmem:[#allocation5] sm:$0xff] }
  0x1e   :  { %204 = vmatpush.msra.mxu0 %v62_v25  ;;  %242 = vmatpush.msra.mxu2 %v96_v31  ;;  %v109_v48 = vld [vmem:[#allocation5 + $0x1b0] sm:$0xff]  ;;  %v72_v51 = vld [vmem:[#allocation5 + $0x88] sm:$0xff]  ;;  %v71_v52 = vld [vmem:[#allocation5 + $0x80] sm:$0xff] }
  0x1f   :  { %224 = vmatpush.msra.mxu1 %v78_v26  ;;  %262 = vmatpush.msra.mxu3 %v112_v36  ;;  %v91_v53 = vld [vmem:[#allocation5 + $0x120] sm:$0xff]  ;;  %v108_v54 = vld [vmem:[#allocation5 + $0x1a8] sm:$0xff]  ;;  %v49_v56 = vld [vmem:[#allocation2 + $0xe] sm:$0xff] }
  0x20   :  { %205 = vmatpush.msra.mxu0 %v61_v29  ;;  %243 = vmatpush.msra.mxu2 %v95_v35  ;;  %v47_v55 = vld [vmem:[#allocation2] sm:$0xff]  ;;  %v134_v58 = vld [vmem:[#allocation5 + $0x278] sm:$0xff]  ;;  %v107_v62 = vld [vmem:[#allocation5 + $0x1a0] sm:$0xff]  ;;  %167 = vst [vmem:[#allocation1 + $0x1] ss:$4 sm:$0xff] %v49_v56 }
  0x21   :  { %225 = vmatpush.msra.mxu1 %v77_v30  ;;  %263 = vmatpush.msra.mxu3 %v111_v40  ;;  %v51_v57 = vld [vmem:[#allocation2 + $0x1c] sm:$0xff]  ;;  %v150_v59 = vld [vmem:[#allocation5 + $0x2f8] sm:$0xff]  ;;  %165 = vst [vmem:[#allocation1] ss:$4 sm:$0xff] %v47_v55  ;;  %v133_v63 = vld [vmem:[#allocation5 + $0x270] sm:$0xff] }
  0x22   :  { %206 = vmatpush.msra.mxu0 %v60_v33  ;;  %244 = vmatpush.msra.mxu2 %v94_v39  ;;  %v53_v60 = vld [vmem:[#allocation2 + $0x2a] sm:$0xff]  ;;  %v132_v0 = vld [vmem:[#allocation5 + $0x268] sm:$0xff]  ;;  %169 = vst [vmem:[#allocation1 + $0x2] ss:$4 sm:$0xff] %v51_v57  ;;  %v50_v6 = vld [vmem:[#allocation2 + $0x16] sm:$0x3f] }
  0x23   :  { %226 = vmatpush.msra.mxu1 %v76_v34  ;;  %264 = vmatpush.msra.mxu3 %v110_v44  ;;  %v90_v61 = vld [vmem:[#allocation5 + $0x118] sm:$0xff]  ;;  %v149_v1 = vld [vmem:[#allocation5 + $0x2f0] sm:$0xff]  ;;  %v148_v2 = vld [vmem:[#allocation5 + $0x2e8] sm:$0xff]  ;;  %171 = vst [vmem:[#allocation1 + $0x3] ss:$4 sm:$0xff] %v53_v60 }
  0x24   :  { %207 = vmatpush.msra.mxu0 %v59_v37  ;;  %245 = vmatpush.msra.mxu2 %v93_v43  ;;  %v89_v3 = vld [vmem:[#allocation5 + $0x110] sm:$0xff]  ;;  %v106_v4 = vld [vmem:[#allocation5 + $0x198] sm:$0xff]  ;;  %v88_v8 = vld [vmem:[#allocation5 + $0x108] sm:$0xff]  ;;  %175 = vst [vmem:[#allocation1 + $0x21] ss:$4 sm:$0xff] %v50_v6 }
  0x25   :  { %227 = vmatpush.msra.mxu1 %v75_v38  ;;  %265 = vmatpush.msra.mxu3 %v109_v48  ;;  %v48_v5 = vld [vmem:[#allocation2 + $0x8] sm:$0x3f]  ;;  %v54_v10 = vld [vmem:[#allocation2 + $0x32] sm:$0x3f]  ;;  %v131_v11 = vld [vmem:[#allocation5 + $0x260] sm:$0xff] }
  0x26   :  { %208 = vmatpush.msra.mxu0 %v58_v41  ;;  %246 = vmatpush.msra.mxu2 %v92_v47  ;;  %v52_v7 = vld [vmem:[#allocation2 + $0x24] sm:$0x3f]  ;;  %173 = vst [vmem:[#allocation1 + $0x20] ss:$4 sm:$0xff] %v48_v5  ;;  %v147_v12 = vld [vmem:[#allocation5 + $0x2e0] sm:$0xff]  ;;  %v130_v15 = vld [vmem:[#allocation5 + $0x258] sm:$0xff] }
  0x27   :  { %228 = vmatpush.msra.mxu1 %v74_v42  ;;  %266 = vmatpush.msra.mxu3 %v108_v54  ;;  %v105_v9 = vld [vmem:[#allocation5 + $0x190] sm:$0xff]  ;;  %v87_v13 = vld [vmem:[#allocation5 + $0x100] sm:$0xff]  ;;  %v104_v14 = vld [vmem:[#allocation5 + $0x188] sm:$0xff]  ;;  %177 = vst [vmem:[#allocation1 + $0x22] ss:$4 sm:$0xff] %v52_v7 }
  0x28   :  { %209 = vmatpush.msra.mxu0 %v57_v45  ;;  %247 = vmatpush.msra.mxu2 %v91_v53  ;;  %v146_v16 = vld [vmem:[#allocation5 + $0x2d8] sm:$0xff]  ;;  %179 = vst [vmem:[#allocation1 + $0x23] ss:$4 sm:$0xff] %v54_v10  ;;  %v103_v17 = vld [vmem:[#allocation5 + $0x180] sm:$0xff]  ;;  %v129_v18 = vld [vmem:[#allocation5 + $0x250] sm:$0xff] }
  0x29   :  { %229 = vmatpush.msra.mxu1 %v73_v46  ;;  %267 = vmatpush.msra.mxu3 %v107_v62  ;;  %v145_v19 = vld [vmem:[#allocation5 + $0x2d0] sm:$0xff]  ;;  %v152_v21 = vld [vmem:[#allocation5 + $0x308] sm:$0xff]  ;;  %v127_v27 = vld [vmem:[#allocation5 + $0x240] sm:$0xff] }
  0x2a   :  { %210 = vmatpush.msra.mxu0 %v56_v49  ;;  %248 = vmatpush.msra.mxu2 %v90_v61  ;;  %v182_v20 = vld.sshfl [vmem:[#allocation1 + $0x10] sm:$0xff pattern:$0x73625140]  ;;  %v180_v22 = vld.sshfl [vmem:[#allocation1] sm:$0xff pattern:$0x73625140] }
  0x2b   :  { %230 = vmatpush.msra.mxu1 %v72_v51  ;;  %268 = vmatpush.msra.mxu3 %v106_v4  ;;  %v128_v23 = vld [vmem:[#allocation5 + $0x248] sm:$0xff]  ;;  %v183_v25 = vld.sshfl [vmem:[#allocation1 + $0x18] sm:$0xff pattern:$0x73625140]  ;;  %v143_v28 = vld [vmem:[#allocation5 + $0x2c0] sm:$0xff] }
  0x2c   :  { %211 = vmatpush.msra.mxu0 %v55_v50  ;;  %249 = vmatpush.msra.mxu2 %v89_v3  ;;  %v144_v24 = vld [vmem:[#allocation5 + $0x2c8] sm:$0xff]  ;;  %v151_v29 = vld [vmem:[#allocation5 + $0x300] sm:$0xff]  ;;  %v126_v30 = vld [vmem:[#allocation5 + $0x238] sm:$0xff] }
  0x2d   :  { %231 = vmatpush.msra.mxu1 %v71_v52  ;;  %269 = vmatpush.msra.mxu3 %v105_v9  ;;  %v181_v26 = vld.sshfl [vmem:[#allocation1 + $0x8] sm:$0xff pattern:$0x73625140]  ;;  %v142_v31 = vld [vmem:[#allocation5 + $0x2b8] sm:$0xff]  ;;  %v125_v33 = vld [vmem:[#allocation5 + $0x230] sm:$0xff] }
  0x2e   :  { %276 = vmatpush.msrb.mxu0 %v134_v58  ;;  %250 = vmatpush.msra.mxu2 %v88_v8  ;;  %v141_v34 = vld [vmem:[#allocation5 + $0x2b0] sm:$0xff]  ;;  %v124_v35 = vld [vmem:[#allocation5 + $0x228] sm:$0xff]  ;;  %v123_v37 = vld [vmem:[#allocation5 + $0x220] sm:$0xff] }
  0x2f   :  { %296 = vmatpush.msrb.mxu1 %v150_v59  ;;  %270 = vmatpush.msra.mxu3 %v104_v14  ;;  %v186_v32 = vld.sshfl [vmem:[#allocation1 + $0x30] sm:$0xff pattern:$0x73625140]  ;;  %v140_v36 = vld [vmem:[#allocation5 + $0x2a8] sm:$0xff]  ;;  %v139_v38 = vld [vmem:[#allocation5 + $0x2a0] sm:$0xff] }
  0x30   :  { %277 = vmatpush.msrb.mxu0 %v133_v63  ;;  %251 = vmatpush.msra.mxu2 %v87_v13  ;;  %v122_v39 = vld [vmem:[#allocation5 + $0x218] sm:$0xff]  ;;  %v121_v41 = vld [vmem:[#allocation5 + $0x210] sm:$0xff]  ;;  %v120_v43 = vld [vmem:[#allocation5 + $0x208] sm:$0xff] }
  0x31   :  { %297 = vmatpush.msrb.mxu1 %v149_v1  ;;  %252 = vmatmul.f32.vlgmr.msra.gmra.mxu2 %v182_v20  ;;  %v138_v40 = vld [vmem:[#allocation5 + $0x298] sm:$0xff]  ;;  %v137_v42 = vld [vmem:[#allocation5 + $0x290] sm:$0xff]  ;;  %v136_v44 = vld [vmem:[#allocation5 + $0x288] sm:$0xff] }
  0x32   :  { %278 = vmatpush.msrb.mxu0 %v132_v0  ;;  %271 = vmatpush.msra.mxu3 %v103_v17  ;;  %v119_v45 = vld [vmem:[#allocation5 + $0x200] sm:$0xff]  ;;  %v185_v48 = vld.sshfl [vmem:[#allocation1 + $0x28] sm:$0xff pattern:$0x73625140] }
  0x33   :  { %298 = vmatpush.msrb.mxu1 %v148_v2  ;;  %330 = vmatpush.msrb.mxu2 %v152_v21  ;;  %v135_v46 = vld [vmem:[#allocation5 + $0x280] sm:$0xff] }
  0x34   :  { %279 = vmatpush.msrb.mxu0 %v131_v11  ;;  %272 = vmatmul.f32.vlgmr.msra.gmra.mxu3 %v183_v25  ;;  %v184_v47 = vld.sshfl [vmem:[#allocation1 + $0x20] sm:$0xff pattern:$0x73625140] }
  0x35   :  { %299 = vmatpush.msrb.mxu1 %v147_v12  ;;  %212 = vmatmul.f32.vlgmr.msra.gmra.mxu0 %v180_v22  ;;  %v367_v49 = vld [vmem:[%s489_s2] ss:$0 sm:$0xff] }
  0x36   :  { %280 = vmatpush.msrb.mxu0 %v130_v15  ;;  %232 = vmatmul.f32.vlgmr.msra.gmra.mxu1 %v181_v26 }
  0x37   :  { %300 = vmatpush.msrb.mxu1 %v146_v16  ;;  %331 = vmatpush.msrb.mxu2 %v151_v29 }
  0x38   :  { %281 = vmatpush.msrb.mxu0 %v129_v18 }
  0x39   :  { %301 = vmatpush.msrb.mxu1 %v145_v19  ;;  %357 = vmatmul.msk.f32.vlgmr.msrb.gmra.mxu2 %vm193_vm0, %v186_v32 }
  0x3a   :  { %282 = vmatpush.msrb.mxu0 %v128_v23 }
  0x3b   :  { %302 = vmatpush.msrb.mxu1 %v144_v24 }
  0x3c   :  { %283 = vmatpush.msrb.mxu0 %v127_v27 }
  0x3d   :  { %303 = vmatpush.msrb.mxu1 %v143_v28 }
  0x3e   :  { %284 = vmatpush.msrb.mxu0 %v126_v30 }
  0x3f   :  { %304 = vmatpush.msrb.mxu1 %v142_v31 }
  0x40   :  { %285 = vmatpush.msrb.mxu0 %v125_v33 }
  0x41   :  { %305 = vmatpush.msrb.mxu1 %v141_v34 }
  0x42   :  { %286 = vmatpush.msrb.mxu0 %v124_v35 }
  0x43   :  { %306 = vmatpush.msrb.mxu1 %v140_v36 }
  0x44   :  { %287 = vmatpush.msrb.mxu0 %v123_v37 }
  0x45   :  { %307 = vmatpush.msrb.mxu1 %v139_v38 }
  0x46   :  { %288 = vmatpush.msrb.mxu0 %v122_v39 }
  0x47   :  { %308 = vmatpush.msrb.mxu1 %v138_v40 }
  0x48   :  { %289 = vmatpush.msrb.mxu0 %v121_v41 }
  0x49   :  { %309 = vmatpush.msrb.mxu1 %v137_v42 }
  0x4a   :  { %290 = vmatpush.msrb.mxu0 %v120_v43 }
  0x4b   :  { %310 = vmatpush.msrb.mxu1 %v136_v44 }
  0x4c   :  { %291 = vmatpush.msrb.mxu0 %v119_v45 }
  0x4d   :  { %311 = vmatpush.msrb.mxu1 %v135_v46  ;;  %292 = vmatmul.f32.vlgmr.msrb.gmra.mxu0 %v184_v47 }
  0x4e   :  { %312 = vmatmul.f32.vlgmr.msrb.gmra.mxu1 %v185_v48 }
  0xb2   :  { %v213_v50 = vpop.f32.mrf.mxu0 }
  0xb3   :  { %v214_v51 = vadd.f32 %v367_v49, %v213_v50  ;;  %v233_v52 = vpop.f32.mrf.mxu1 }
  0xb4   :  { %v253_v54 = vpop.f32.mrf.mxu2 }
  0xb5   :  { %v234_v53 = vadd.f32 %v233_v52, %v214_v51 }
  0xb7   :  { %v254_v55 = vadd.f32 %v253_v54, %v234_v53  ;;  %v273_v56 = vpop.f32.mrf.mxu3 }
  0xb9   :  { %v274_v57 = vadd.f32 %v273_v56, %v254_v55 }
  0xbc   :  { %v333_v61 = vpop.f32.mrf.mxu2 }
  0xca   :  { %v293_v58 = vpop.f32.mrf.mxu0 }
  0xcb   :  { %v313_v59 = vpop.f32.mrf.mxu1  ;;  %v294_v60 = vadd.f32 %v293_v58, %v274_v57 }
  0xcd   :  { %v314_v62 = vadd.f32 %v313_v59, %v294_v60 }
  0xcf   :  { %v334_v63 = vadd.f32 %v333_v61, %v314_v62 }
  0xd1   :  { %336 = vst [vmem:[#allocation7] sm:$0xff] %v334_v63 }
  0xd2   :  { %340 = vsyncadd [#allocation4], 96  ;;  %s343_s2 = sshll.u32 %s490_s3, 4  ;;  %s452_s28 = smov [#allocation7]   ;;  %s344_s2 = int_to_ptr.hbm [resolvable:$true] %s343_s2 }
  0xd3   :  { %s341_s29 = sshll.u32 %s452_s28, 4  ;;  %s453_s30 = smov 32   ;;  %s342_s29 = int_to_ptr.vmem [resolvable:$true] %s341_s29 }
  0xd4   :  { %s454_s4 = smov 2  }
  0xd5   :  { %349 = dma.vmem_to_hbm [thread:$0]  %s342_s29, 32, %s344_s2, [#allocation4], %s453_s30, %s453_s30, %s454_s4  }
  0xd6   :  { %444 = dma.done.wait [#allocation4], 128  }
  0xd7   :  { %445 = vsyncadd [#allocation4], 4294967168 }
  0xd8   :  { %354 = vsyncpa [#allocation3], 1 }
  0xd9   :  { %355 = vsyncpa [#allocation6], 1 }
  0xda   :  { %356 = vsyncpa [#allocation4], 1 }

</bundles_post_ra>
